<compile_context>
chip_gen: v6e
topology: v6e:2x2x1
jax: 0.10.0
libtpu: 0.0.40
codegen_flags: <defaults>
</compile_context>

<pallas_src>
import functools
import math

import jax
import jax.numpy as jnp
from jax import lax
from jax.experimental import pallas as pl
from jax.experimental.pallas import tpu as pltpu


def _round_up(x, m):
    return ((x + m - 1) // m) * m


def _pick_tile_t(total_tokens, align, cap):
    """Big tiles (amortize per-step overhead), multiple of `align`, <= cap,
    and giving >= 2 grid steps when the problem allows it."""
    cap = max(align, (cap // align) * align)
    if total_tokens <= align:
        return align
    half = -(-total_tokens // 2)          # cdiv(total_tokens, 2)
    tile = min(cap, _round_up(half, align))
    return max(align, tile)


# ----------------------------------------------------------------------------
# Path 1: table resident in VMEM, gather via dynamic VMEM reads (lane-packed).
# ----------------------------------------------------------------------------
def _vmem_gather_kernel(ids_ref, table_ref, out_ref, *, scale, tile_t, k):
    """ids_ref: SMEM (t_pad,) int32 (scalar prefetch);
    table_ref: VMEM (V, D) (same block every step -> resident);
    out_ref  : VMEM (tile_t//k, k*D) lane-dense output block."""
    rows = tile_t // k                      # static, multiple of 8
    base = pl.program_id(0) * tile_t
    s = jnp.float32(scale)

    def body(r, carry):
        tok = base + r * k
        parts = [table_ref[pl.ds(ids_ref[tok + j], 1), :] for j in range(k)]
        row = parts[0] if k == 1 else jnp.concatenate(parts, axis=-1)
        out_ref[pl.ds(r, 1), :] = (row * s).astype(out_ref.dtype)
        return carry

    lax.fori_loop(0, rows, body, 0, unroll=8)


# ----------------------------------------------------------------------------
# Path 2: table in HBM, per-row DMAs with double-buffered cross-tile prefetch.
# ----------------------------------------------------------------------------
def _hbm_gather_kernel(ids_ref, table_hbm, out_ref, row_buf, sem, *,
                       scale, tile_t):
    """ids_ref: SMEM (t_pad,) int32;  table_hbm: HBM (V, D);
    out_ref: VMEM (tile_t, D);  row_buf: VMEM (2, tile_t, D);  sem: DMA (2,)."""
    i = pl.program_id(0)
    n = pl.num_programs(0)
    slot = lax.rem(i, 2)

    def issue(step, s):
        base = step * tile_t

        def start_one(t, carry):
            idx = ids_ref[base + t]
            pltpu.make_async_copy(table_hbm.at[idx], row_buf.at[s, t],
                                  sem.at[s]).start()
            return carry

        lax.fori_loop(0, tile_t, start_one, 0, unroll=8)

    @pl.when(i == 0)                       # prime the pipeline
    def _():
        issue(0, 0)

    @pl.when(i + 1 < n)                    # prefetch next tile before waiting
    def _():
        issue(i + 1, 1 - slot)

    # Aggregated wait: every row DMA signalled sem[slot] with D*itemsize bytes;
    # one wait whose destination is the full (tile_t, D) buffer consumes all of
    # them (receiver-side wait idiom: src == dst, only dst bytes + sem matter).
    pltpu.make_async_copy(row_buf.at[slot], row_buf.at[slot],
                          sem.at[slot]).wait()

    out_ref[...] = (row_buf[slot] * jnp.float32(scale)).astype(out_ref.dtype)


# ----------------------------------------------------------------------------
# Wrapper
# ----------------------------------------------------------------------------
def textual_encoder_forward(text, embedding_table, *, tile_t=None,
                            vmem_table_bytes=4 * 1024 * 1024,
                            xla_fallback_elems=0):
    """lut(text) * sqrt(d_model).  text: [B, S] int ids; table: [V, D]."""
    B, S = text.shape
    V, D = embedding_table.shape
    T = B * S
    dtype = embedding_table.dtype
    elem_bytes = jnp.dtype(dtype).itemsize
    scale = math.sqrt(D)

    # Optional tiny-problem fallback (disabled by default so the Pallas kernel
    # is always exercised): XLA's fused gather wins below a launch threshold.
    if T * D <= xla_fallback_elems:
        return jnp.take(embedding_table, text, axis=0) * jnp.asarray(scale, dtype)

    # OOB ids are clamped (torch.nn.Embedding would raise; valid ids unchanged).
    ids = jnp.clip(text.reshape(T).astype(jnp.int32), 0, V - 1)

    table_bytes = V * D * elem_bytes
    use_vmem_table = table_bytes <= vmem_table_bytes

    if use_vmem_table:
        # Lane-pack k tokens per 128-lane output row when D < 128.
        k = 128 // D if (D < 128 and 128 % D == 0) else 1
        align = 8 * k
        # ~4 MiB budget for the two pipelined output buffers.
        cap = max(align, (4 * 1024 * 1024) // max(1, 2 * D * elem_bytes))
        cap = min(cap, 2048)
    else:
        k = 1
        align = 8
        # ~4 MiB across row_buf(x2) + out(x2); also bound the per-tile DMA count.
        cap = max(align, (4 * 1024 * 1024) // max(1, 4 * D * elem_bytes))
        cap = min(cap, 256)

    if tile_t is None:
        tile_t = _pick_tile_t(T, align, cap)
    else:
        tile_t = _round_up(max(tile_t, align), align)

    t_pad = _round_up(T, tile_t)
    if t_pad != T:
        ids = jnp.concatenate([ids, jnp.zeros((t_pad - T,), jnp.int32)])

    grid = (t_pad // tile_t,)

    cost = pl.CostEstimate(
        flops=t_pad * D,                                   # the sqrt(D) scale
        transcendentals=0,
        bytes_accessed=2 * t_pad * D * elem_bytes + t_pad * 4,
    )

    if use_vmem_table:
        rows_per_block = tile_t // k
        kernel = functools.partial(_vmem_gather_kernel, scale=scale,
                                   tile_t=tile_t, k=k)
        out_packed = pl.pallas_call(
            kernel,
            out_shape=jax.ShapeDtypeStruct((t_pad // k, k * D), dtype),
            grid_spec=pltpu.PrefetchScalarGridSpec(
                num_scalar_prefetch=1,                     # ids -> SMEM
                grid=grid,
                in_specs=[
                    # Whole table resident in VMEM: same block every step.
                    pl.BlockSpec((V, D), lambda i, ids: (0, 0)),
                ],
                out_specs=pl.BlockSpec((rows_per_block, k * D),
                                       lambda i, ids: (i, 0)),
            ),
            compiler_params=pltpu.CompilerParams(
                dimension_semantics=("parallel",),         # v7x: both TCs work
                vmem_limit_bytes=32 * 1024 * 1024,
            ),
            cost_estimate=cost,
        )(ids, embedding_table)
        out_flat = out_packed.reshape(t_pad, D)            # row-major, free-ish
    else:
        kernel = functools.partial(_hbm_gather_kernel, scale=scale,
                                   tile_t=tile_t)
        out_flat = pl.pallas_call(
            kernel,
            out_shape=jax.ShapeDtypeStruct((t_pad, D), dtype),
            grid_spec=pltpu.PrefetchScalarGridSpec(
                num_scalar_prefetch=1,                     # ids -> SMEM
                grid=grid,
                in_specs=[pl.BlockSpec(memory_space=pl.ANY)],  # table in HBM
                out_specs=pl.BlockSpec((tile_t, D), lambda i, ids: (i, 0)),
                scratch_shapes=[
                    pltpu.VMEM((2, tile_t, D), dtype),     # gather double buffer
                    pltpu.SemaphoreType.DMA((2,)),         # one agg. sem / slot
                ],
            ),
            compiler_params=pltpu.CompilerParams(
                # Carried double-buffer state across steps -> sequential grid.
                dimension_semantics=("arbitrary",),
                vmem_limit_bytes=32 * 1024 * 1024,
            ),
            cost_estimate=cost,
        )(ids, embedding_table)

    if t_pad != T:
        out_flat = out_flat[:T]
    return out_flat.reshape(B, S, D)


if __name__ == "__main__":
    # Synthetic "opt": hidden_size=32, src_num_class (vocab)=16, lang_type='src'
    hidden_size = 32
    src_num_class = 16
    batch, seq = 2, 32          # T = 64 -> 2 grid steps, t_pad == T

    key = jax.random.PRNGKey(0)
    k_tab, k_ids = jax.random.split(key)

    # nn.Embedding default init: N(0, 1)
    embedding_table = jax.random.normal(
        k_tab, (src_num_class, hidden_size), dtype=jnp.float32)
    text = jax.random.randint(k_ids, (batch, seq), 0, src_num_class,
                              dtype=jnp.int32)

    ref = jnp.take(embedding_table, text, axis=0) * math.sqrt(hidden_size)

    # Fast path: table resident in VMEM, lane-packed output.
    out_fast = jax.block_until_ready(
        textual_encoder_forward(text, embedding_table))
    assert out_fast.shape == (batch, seq, hidden_size)
    assert jnp.allclose(out_fast, ref, atol=1e-5, rtol=1e-5)

    # Large-table path (forced): HBM gather with prefetch + aggregated waits.
    out_hbm = jax.block_until_ready(
        textual_encoder_forward(text, embedding_table, vmem_table_bytes=0))
    assert out_hbm.shape == (batch, seq, hidden_size)
    assert jnp.allclose(out_hbm, ref, atol=1e-5, rtol=1e-5)

    print("KERNEL_OK")
</pallas_src>

<mosaic_0001>
module attributes {stable_mosaic.version = 11 : i64} {
  func.func @_vmem_gather_kernel(%arg0: i32, %arg1: memref<64xi32, #tpu.memory_space<smem>>, %arg2: memref<16x32xf32, #tpu.memory_space<vmem>>, %arg3: memref<8x128xf32, #tpu.memory_space<vmem>>) attributes {dimension_semantics = [#tpu.dimension_semantics<parallel>], iteration_bounds = array<i64: 2>, scalar_prefetch = 1 : i64, scratch_operands = 0 : i64, tpu.core_type = #tpu.core_type<tc>, window_params = [{pipeline_mode = #tpu.pipeline_mode<synchronous>, transform_indices = @transform_0, window_bounds = array<i64: 16, 32>}, {transform_indices = @transform_1, window_bounds = array<i64: 8, 128>}]} {
    %c32_i32 = arith.constant 32 : i32
    %0 = arith.muli %arg0, %c32_i32 : i32
    %cst = arith.constant 5.65685415 : f32
    %c0_i32 = arith.constant 0 : i32
    %c4_i32 = arith.constant 4 : i32
    %1 = arith.muli %c0_i32, %c4_i32 : i32
    %2 = arith.addi %0, %1 : i32
    %c0_i32_0 = arith.constant 0 : i32
    %3 = arith.addi %2, %c0_i32_0 : i32
    %4 = arith.index_cast %3 : i32 to index
    %5 = memref.load %arg1[%4] : memref<64xi32, #tpu.memory_space<smem>>
    %6 = arith.index_cast %5 : i32 to index
    %c0 = arith.constant 0 : index
    %7 = vector.load %arg2[%6, %c0] : memref<16x32xf32, #tpu.memory_space<vmem>>, vector<1x32xf32>
    %c1_i32 = arith.constant 1 : i32
    %8 = arith.addi %2, %c1_i32 : i32
    %9 = arith.index_cast %8 : i32 to index
    %10 = memref.load %arg1[%9] : memref<64xi32, #tpu.memory_space<smem>>
    %11 = arith.index_cast %10 : i32 to index
    %c0_1 = arith.constant 0 : index
    %12 = vector.load %arg2[%11, %c0_1] : memref<16x32xf32, #tpu.memory_space<vmem>>, vector<1x32xf32>
    %c2_i32 = arith.constant 2 : i32
    %13 = arith.addi %2, %c2_i32 : i32
    %14 = arith.index_cast %13 : i32 to index
    %15 = memref.load %arg1[%14] : memref<64xi32, #tpu.memory_space<smem>>
    %16 = arith.index_cast %15 : i32 to index
    %c0_2 = arith.constant 0 : index
    %17 = vector.load %arg2[%16, %c0_2] : memref<16x32xf32, #tpu.memory_space<vmem>>, vector<1x32xf32>
    %c3_i32 = arith.constant 3 : i32
    %18 = arith.addi %2, %c3_i32 : i32
    %19 = arith.index_cast %18 : i32 to index
    %20 = memref.load %arg1[%19] : memref<64xi32, #tpu.memory_space<smem>>
    %21 = arith.index_cast %20 : i32 to index
    %c0_3 = arith.constant 0 : index
    %22 = vector.load %arg2[%21, %c0_3] : memref<16x32xf32, #tpu.memory_space<vmem>>, vector<1x32xf32>
    %23 = tpu.concatenate %7, %12, %17, %22 in 1 : vector<1x32xf32>, vector<1x32xf32>, vector<1x32xf32>, vector<1x32xf32> -> vector<1x128xf32>
    %24 = vector.broadcast %cst : f32 to vector<1x128xf32>
    %25 = arith.mulf %23, %24 : vector<1x128xf32>
    %26 = arith.index_cast %c0_i32 : i32 to index
    %c0_4 = arith.constant 0 : index
    %27 = vector.load %arg3[%26, %c0_4] : memref<8x128xf32, #tpu.memory_space<vmem>>, vector<1x128xf32>
    tpu.vector_store %arg3[%26, %c0_4], %25 {strides = array<i32>} : memref<8x128xf32, #tpu.memory_space<vmem>>, vector<1x128xf32>,
    %c1_i32_5 = arith.constant 1 : i32
    %c4_i32_6 = arith.constant 4 : i32
    %28 = arith.muli %c1_i32_5, %c4_i32_6 : i32
    %29 = arith.addi %0, %28 : i32
    %c0_i32_7 = arith.constant 0 : i32
    %30 = arith.addi %29, %c0_i32_7 : i32
    %31 = arith.index_cast %30 : i32 to index
    %32 = memref.load %arg1[%31] : memref<64xi32, #tpu.memory_space<smem>>
    %33 = arith.index_cast %32 : i32 to index
    %c0_8 = arith.constant 0 : index
    %34 = vector.load %arg2[%33, %c0_8] : memref<16x32xf32, #tpu.memory_space<vmem>>, vector<1x32xf32>
    %c1_i32_9 = arith.constant 1 : i32
    %35 = arith.addi %29, %c1_i32_9 : i32
    %36 = arith.index_cast %35 : i32 to index
    %37 = memref.load %arg1[%36] : memref<64xi32, #tpu.memory_space<smem>>
    %38 = arith.index_cast %37 : i32 to index
    %c0_10 = arith.constant 0 : index
    %39 = vector.load %arg2[%38, %c0_10] : memref<16x32xf32, #tpu.memory_space<vmem>>, vector<1x32xf32>
    %c2_i32_11 = arith.constant 2 : i32
    %40 = arith.addi %29, %c2_i32_11 : i32
    %41 = arith.index_cast %40 : i32 to index
    %42 = memref.load %arg1[%41] : memref<64xi32, #tpu.memory_space<smem>>
    %43 = arith.index_cast %42 : i32 to index
    %c0_12 = arith.constant 0 : index
    %44 = vector.load %arg2[%43, %c0_12] : memref<16x32xf32, #tpu.memory_space<vmem>>, vector<1x32xf32>
    %c3_i32_13 = arith.constant 3 : i32
    %45 = arith.addi %29, %c3_i32_13 : i32
    %46 = arith.index_cast %45 : i32 to index
    %47 = memref.load %arg1[%46] : memref<64xi32, #tpu.memory_space<smem>>
    %48 = arith.index_cast %47 : i32 to index
    %c0_14 = arith.constant 0 : index
    %49 = vector.load %arg2[%48, %c0_14] : memref<16x32xf32, #tpu.memory_space<vmem>>, vector<1x32xf32>
    %50 = tpu.concatenate %34, %39, %44, %49 in 1 : vector<1x32xf32>, vector<1x32xf32>, vector<1x32xf32>, vector<1x32xf32> -> vector<1x128xf32>
    %51 = vector.broadcast %cst : f32 to vector<1x128xf32>
    %52 = arith.mulf %50, %51 : vector<1x128xf32>
    %53 = arith.index_cast %c1_i32_5 : i32 to index
    %c0_15 = arith.constant 0 : index
    %54 = vector.load %arg3[%53, %c0_15] : memref<8x128xf32, #tpu.memory_space<vmem>>, vector<1x128xf32>
    tpu.vector_store %arg3[%53, %c0_15], %52 {strides = array<i32>} : memref<8x128xf32, #tpu.memory_space<vmem>>, vector<1x128xf32>,
    %c2_i32_16 = arith.constant 2 : i32
    %c4_i32_17 = arith.constant 4 : i32
    %55 = arith.muli %c2_i32_16, %c4_i32_17 : i32
    %56 = arith.addi %0, %55 : i32
    %c0_i32_18 = arith.constant 0 : i32
    %57 = arith.addi %56, %c0_i32_18 : i32
    %58 = arith.index_cast %57 : i32 to index
    %59 = memref.load %arg1[%58] : memref<64xi32, #tpu.memory_space<smem>>
    %60 = arith.index_cast %59 : i32 to index
    %c0_19 = arith.constant 0 : index
    %61 = vector.load %arg2[%60, %c0_19] : memref<16x32xf32, #tpu.memory_space<vmem>>, vector<1x32xf32>
    %c1_i32_20 = arith.constant 1 : i32
    %62 = arith.addi %56, %c1_i32_20 : i32
    %63 = arith.index_cast %62 : i32 to index
    %64 = memref.load %arg1[%63] : memref<64xi32, #tpu.memory_space<smem>>
    %65 = arith.index_cast %64 : i32 to index
    %c0_21 = arith.constant 0 : index
    %66 = vector.load %arg2[%65, %c0_21] : memref<16x32xf32, #tpu.memory_space<vmem>>, vector<1x32xf32>
    %c2_i32_22 = arith.constant 2 : i32
    %67 = arith.addi %56, %c2_i32_22 : i32
    %68 = arith.index_cast %67 : i32 to index
    %69 = memref.load %arg1[%68] : memref<64xi32, #tpu.memory_space<smem>>
    %70 = arith.index_cast %69 : i32 to index
    %c0_23 = arith.constant 0 : index
    %71 = vector.load %arg2[%70, %c0_23] : memref<16x32xf32, #tpu.memory_space<vmem>>, vector<1x32xf32>
    %c3_i32_24 = arith.constant 3 : i32
    %72 = arith.addi %56, %c3_i32_24 : i32
    %73 = arith.index_cast %72 : i32 to index
    %74 = memref.load %arg1[%73] : memref<64xi32, #tpu.memory_space<smem>>
    %75 = arith.index_cast %74 : i32 to index
    %c0_25 = arith.constant 0 : index
    %76 = vector.load %arg2[%75, %c0_25] : memref<16x32xf32, #tpu.memory_space<vmem>>, vector<1x32xf32>
    %77 = tpu.concatenate %61, %66, %71, %76 in 1 : vector<1x32xf32>, vector<1x32xf32>, vector<1x32xf32>, vector<1x32xf32> -> vector<1x128xf32>
    %78 = vector.broadcast %cst : f32 to vector<1x128xf32>
    %79 = arith.mulf %77, %78 : vector<1x128xf32>
    %80 = arith.index_cast %c2_i32_16 : i32 to index
    %c0_26 = arith.constant 0 : index
    %81 = vector.load %arg3[%80, %c0_26] : memref<8x128xf32, #tpu.memory_space<vmem>>, vector<1x128xf32>
    tpu.vector_store %arg3[%80, %c0_26], %79 {strides = array<i32>} : memref<8x128xf32, #tpu.memory_space<vmem>>, vector<1x128xf32>,
    %c3_i32_27 = arith.constant 3 : i32
    %c4_i32_28 = arith.constant 4 : i32
    %82 = arith.muli %c3_i32_27, %c4_i32_28 : i32
    %83 = arith.addi %0, %82 : i32
    %c0_i32_29 = arith.constant 0 : i32
    %84 = arith.addi %83, %c0_i32_29 : i32
    %85 = arith.index_cast %84 : i32 to index
    %86 = memref.load %arg1[%85] : memref<64xi32, #tpu.memory_space<smem>>
    %87 = arith.index_cast %86 : i32 to index
    %c0_30 = arith.constant 0 : index
    %88 = vector.load %arg2[%87, %c0_30] : memref<16x32xf32, #tpu.memory_space<vmem>>, vector<1x32xf32>
    %c1_i32_31 = arith.constant 1 : i32
    %89 = arith.addi %83, %c1_i32_31 : i32
    %90 = arith.index_cast %89 : i32 to index
    %91 = memref.load %arg1[%90] : memref<64xi32, #tpu.memory_space<smem>>
    %92 = arith.index_cast %91 : i32 to index
    %c0_32 = arith.constant 0 : index
    %93 = vector.load %arg2[%92, %c0_32] : memref<16x32xf32, #tpu.memory_space<vmem>>, vector<1x32xf32>
    %c2_i32_33 = arith.constant 2 : i32
    %94 = arith.addi %83, %c2_i32_33 : i32
    %95 = arith.index_cast %94 : i32 to index
    %96 = memref.load %arg1[%95] : memref<64xi32, #tpu.memory_space<smem>>
    %97 = arith.index_cast %96 : i32 to index
    %c0_34 = arith.constant 0 : index
    %98 = vector.load %arg2[%97, %c0_34] : memref<16x32xf32, #tpu.memory_space<vmem>>, vector<1x32xf32>
    %c3_i32_35 = arith.constant 3 : i32
    %99 = arith.addi %83, %c3_i32_35 : i32
    %100 = arith.index_cast %99 : i32 to index
    %101 = memref.load %arg1[%100] : memref<64xi32, #tpu.memory_space<smem>>
    %102 = arith.index_cast %101 : i32 to index
    %c0_36 = arith.constant 0 : index
    %103 = vector.load %arg2[%102, %c0_36] : memref<16x32xf32, #tpu.memory_space<vmem>>, vector<1x32xf32>
    %104 = tpu.concatenate %88, %93, %98, %103 in 1 : vector<1x32xf32>, vector<1x32xf32>, vector<1x32xf32>, vector<1x32xf32> -> vector<1x128xf32>
    %105 = vector.broadcast %cst : f32 to vector<1x128xf32>
    %106 = arith.mulf %104, %105 : vector<1x128xf32>
    %107 = arith.index_cast %c3_i32_27 : i32 to index
    %c0_37 = arith.constant 0 : index
    %108 = vector.load %arg3[%107, %c0_37] : memref<8x128xf32, #tpu.memory_space<vmem>>, vector<1x128xf32>
    tpu.vector_store %arg3[%107, %c0_37], %106 {strides = array<i32>} : memref<8x128xf32, #tpu.memory_space<vmem>>, vector<1x128xf32>,
    %c4_i32_38 = arith.constant 4 : i32
    %c4_i32_39 = arith.constant 4 : i32
    %109 = arith.muli %c4_i32_38, %c4_i32_39 : i32
    %110 = arith.addi %0, %109 : i32
    %c0_i32_40 = arith.constant 0 : i32
    %111 = arith.addi %110, %c0_i32_40 : i32
    %112 = arith.index_cast %111 : i32 to index
    %113 = memref.load %arg1[%112] : memref<64xi32, #tpu.memory_space<smem>>
    %114 = arith.index_cast %113 : i32 to index
    %c0_41 = arith.constant 0 : index
    %115 = vector.load %arg2[%114, %c0_41] : memref<16x32xf32, #tpu.memory_space<vmem>>, vector<1x32xf32>
    %c1_i32_42 = arith.constant 1 : i32
    %116 = arith.addi %110, %c1_i32_42 : i32
    %117 = arith.index_cast %116 : i32 to index
    %118 = memref.load %arg1[%117] : memref<64xi32, #tpu.memory_space<smem>>
    %119 = arith.index_cast %118 : i32 to index
    %c0_43 = arith.constant 0 : index
    %120 = vector.load %arg2[%119, %c0_43] : memref<16x32xf32, #tpu.memory_space<vmem>>, vector<1x32xf32>
    %c2_i32_44 = arith.constant 2 : i32
    %121 = arith.addi %110, %c2_i32_44 : i32
    %122 = arith.index_cast %121 : i32 to index
    %123 = memref.load %arg1[%122] : memref<64xi32, #tpu.memory_space<smem>>
    %124 = arith.index_cast %123 : i32 to index
    %c0_45 = arith.constant 0 : index
    %125 = vector.load %arg2[%124, %c0_45] : memref<16x32xf32, #tpu.memory_space<vmem>>, vector<1x32xf32>
    %c3_i32_46 = arith.constant 3 : i32
    %126 = arith.addi %110, %c3_i32_46 : i32
    %127 = arith.index_cast %126 : i32 to index
    %128 = memref.load %arg1[%127] : memref<64xi32, #tpu.memory_space<smem>>
    %129 = arith.index_cast %128 : i32 to index
    %c0_47 = arith.constant 0 : index
    %130 = vector.load %arg2[%129, %c0_47] : memref<16x32xf32, #tpu.memory_space<vmem>>, vector<1x32xf32>
    %131 = tpu.concatenate %115, %120, %125, %130 in 1 : vector<1x32xf32>, vector<1x32xf32>, vector<1x32xf32>, vector<1x32xf32> -> vector<1x128xf32>
    %132 = vector.broadcast %cst : f32 to vector<1x128xf32>
    %133 = arith.mulf %131, %132 : vector<1x128xf32>
    %134 = arith.index_cast %c4_i32_38 : i32 to index
    %c0_48 = arith.constant 0 : index
    %135 = vector.load %arg3[%134, %c0_48] : memref<8x128xf32, #tpu.memory_space<vmem>>, vector<1x128xf32>
    tpu.vector_store %arg3[%134, %c0_48], %133 {strides = array<i32>} : memref<8x128xf32, #tpu.memory_space<vmem>>, vector<1x128xf32>,
    %c5_i32 = arith.constant 5 : i32
    %c4_i32_49 = arith.constant 4 : i32
    %136 = arith.muli %c5_i32, %c4_i32_49 : i32
    %137 = arith.addi %0, %136 : i32
    %c0_i32_50 = arith.constant 0 : i32
    %138 = arith.addi %137, %c0_i32_50 : i32
    %139 = arith.index_cast %138 : i32 to index
    %140 = memref.load %arg1[%139] : memref<64xi32, #tpu.memory_space<smem>>
    %141 = arith.index_cast %140 : i32 to index
    %c0_51 = arith.constant 0 : index
    %142 = vector.load %arg2[%141, %c0_51] : memref<16x32xf32, #tpu.memory_space<vmem>>, vector<1x32xf32>
    %c1_i32_52 = arith.constant 1 : i32
    %143 = arith.addi %137, %c1_i32_52 : i32
    %144 = arith.index_cast %143 : i32 to index
    %145 = memref.load %arg1[%144] : memref<64xi32, #tpu.memory_space<smem>>
    %146 = arith.index_cast %145 : i32 to index
    %c0_53 = arith.constant 0 : index
    %147 = vector.load %arg2[%146, %c0_53] : memref<16x32xf32, #tpu.memory_space<vmem>>, vector<1x32xf32>
    %c2_i32_54 = arith.constant 2 : i32
    %148 = arith.addi %137, %c2_i32_54 : i32
    %149 = arith.index_cast %148 : i32 to index
    %150 = memref.load %arg1[%149] : memref<64xi32, #tpu.memory_space<smem>>
    %151 = arith.index_cast %150 : i32 to index
    %c0_55 = arith.constant 0 : index
    %152 = vector.load %arg2[%151, %c0_55] : memref<16x32xf32, #tpu.memory_space<vmem>>, vector<1x32xf32>
    %c3_i32_56 = arith.constant 3 : i32
    %153 = arith.addi %137, %c3_i32_56 : i32
    %154 = arith.index_cast %153 : i32 to index
    %155 = memref.load %arg1[%154] : memref<64xi32, #tpu.memory_space<smem>>
    %156 = arith.index_cast %155 : i32 to index
    %c0_57 = arith.constant 0 : index
    %157 = vector.load %arg2[%156, %c0_57] : memref<16x32xf32, #tpu.memory_space<vmem>>, vector<1x32xf32>
    %158 = tpu.concatenate %142, %147, %152, %157 in 1 : vector<1x32xf32>, vector<1x32xf32>, vector<1x32xf32>, vector<1x32xf32> -> vector<1x128xf32>
    %159 = vector.broadcast %cst : f32 to vector<1x128xf32>
    %160 = arith.mulf %158, %159 : vector<1x128xf32>
    %161 = arith.index_cast %c5_i32 : i32 to index
    %c0_58 = arith.constant 0 : index
    %162 = vector.load %arg3[%161, %c0_58] : memref<8x128xf32, #tpu.memory_space<vmem>>, vector<1x128xf32>
    tpu.vector_store %arg3[%161, %c0_58], %160 {strides = array<i32>} : memref<8x128xf32, #tpu.memory_space<vmem>>, vector<1x128xf32>,
    %c6_i32 = arith.constant 6 : i32
    %c4_i32_59 = arith.constant 4 : i32
    %163 = arith.muli %c6_i32, %c4_i32_59 : i32
    %164 = arith.addi %0, %163 : i32
    %c0_i32_60 = arith.constant 0 : i32
    %165 = arith.addi %164, %c0_i32_60 : i32
    %166 = arith.index_cast %165 : i32 to index
    %167 = memref.load %arg1[%166] : memref<64xi32, #tpu.memory_space<smem>>
    %168 = arith.index_cast %167 : i32 to index
    %c0_61 = arith.constant 0 : index
    %169 = vector.load %arg2[%168, %c0_61] : memref<16x32xf32, #tpu.memory_space<vmem>>, vector<1x32xf32>
    %c1_i32_62 = arith.constant 1 : i32
    %170 = arith.addi %164, %c1_i32_62 : i32
    %171 = arith.index_cast %170 : i32 to index
    %172 = memref.load %arg1[%171] : memref<64xi32, #tpu.memory_space<smem>>
    %173 = arith.index_cast %172 : i32 to index
    %c0_63 = arith.constant 0 : index
    %174 = vector.load %arg2[%173, %c0_63] : memref<16x32xf32, #tpu.memory_space<vmem>>, vector<1x32xf32>
    %c2_i32_64 = arith.constant 2 : i32
    %175 = arith.addi %164, %c2_i32_64 : i32
    %176 = arith.index_cast %175 : i32 to index
    %177 = memref.load %arg1[%176] : memref<64xi32, #tpu.memory_space<smem>>
    %178 = arith.index_cast %177 : i32 to index
    %c0_65 = arith.constant 0 : index
    %179 = vector.load %arg2[%178, %c0_65] : memref<16x32xf32, #tpu.memory_space<vmem>>, vector<1x32xf32>
    %c3_i32_66 = arith.constant 3 : i32
    %180 = arith.addi %164, %c3_i32_66 : i32
    %181 = arith.index_cast %180 : i32 to index
    %182 = memref.load %arg1[%181] : memref<64xi32, #tpu.memory_space<smem>>
    %183 = arith.index_cast %182 : i32 to index
    %c0_67 = arith.constant 0 : index
    %184 = vector.load %arg2[%183, %c0_67] : memref<16x32xf32, #tpu.memory_space<vmem>>, vector<1x32xf32>
    %185 = tpu.concatenate %169, %174, %179, %184 in 1 : vector<1x32xf32>, vector<1x32xf32>, vector<1x32xf32>, vector<1x32xf32> -> vector<1x128xf32>
    %186 = vector.broadcast %cst : f32 to vector<1x128xf32>
    %187 = arith.mulf %185, %186 : vector<1x128xf32>
    %188 = arith.index_cast %c6_i32 : i32 to index
    %c0_68 = arith.constant 0 : index
    %189 = vector.load %arg3[%188, %c0_68] : memref<8x128xf32, #tpu.memory_space<vmem>>, vector<1x128xf32>
    tpu.vector_store %arg3[%188, %c0_68], %187 {strides = array<i32>} : memref<8x128xf32, #tpu.memory_space<vmem>>, vector<1x128xf32>,
    %c7_i32 = arith.constant 7 : i32
    %c4_i32_69 = arith.constant 4 : i32
    %190 = arith.muli %c7_i32, %c4_i32_69 : i32
    %191 = arith.addi %0, %190 : i32
    %c0_i32_70 = arith.constant 0 : i32
    %192 = arith.addi %191, %c0_i32_70 : i32
    %193 = arith.index_cast %192 : i32 to index
    %194 = memref.load %arg1[%193] : memref<64xi32, #tpu.memory_space<smem>>
    %195 = arith.index_cast %194 : i32 to index
    %c0_71 = arith.constant 0 : index
    %196 = vector.load %arg2[%195, %c0_71] : memref<16x32xf32, #tpu.memory_space<vmem>>, vector<1x32xf32>
    %c1_i32_72 = arith.constant 1 : i32
    %197 = arith.addi %191, %c1_i32_72 : i32
    %198 = arith.index_cast %197 : i32 to index
    %199 = memref.load %arg1[%198] : memref<64xi32, #tpu.memory_space<smem>>
    %200 = arith.index_cast %199 : i32 to index
    %c0_73 = arith.constant 0 : index
    %201 = vector.load %arg2[%200, %c0_73] : memref<16x32xf32, #tpu.memory_space<vmem>>, vector<1x32xf32>
    %c2_i32_74 = arith.constant 2 : i32
    %202 = arith.addi %191, %c2_i32_74 : i32
    %203 = arith.index_cast %202 : i32 to index
    %204 = memref.load %arg1[%203] : memref<64xi32, #tpu.memory_space<smem>>
    %205 = arith.index_cast %204 : i32 to index
    %c0_75 = arith.constant 0 : index
    %206 = vector.load %arg2[%205, %c0_75] : memref<16x32xf32, #tpu.memory_space<vmem>>, vector<1x32xf32>
    %c3_i32_76 = arith.constant 3 : i32
    %207 = arith.addi %191, %c3_i32_76 : i32
    %208 = arith.index_cast %207 : i32 to index
    %209 = memref.load %arg1[%208] : memref<64xi32, #tpu.memory_space<smem>>
    %210 = arith.index_cast %209 : i32 to index
    %c0_77 = arith.constant 0 : index
    %211 = vector.load %arg2[%210, %c0_77] : memref<16x32xf32, #tpu.memory_space<vmem>>, vector<1x32xf32>
    %212 = tpu.concatenate %196, %201, %206, %211 in 1 : vector<1x32xf32>, vector<1x32xf32>, vector<1x32xf32>, vector<1x32xf32> -> vector<1x128xf32>
    %213 = vector.broadcast %cst : f32 to vector<1x128xf32>
    %214 = arith.mulf %212, %213 : vector<1x128xf32>
    %215 = arith.index_cast %c7_i32 : i32 to index
    %c0_78 = arith.constant 0 : index
    %216 = vector.load %arg3[%215, %c0_78] : memref<8x128xf32, #tpu.memory_space<vmem>>, vector<1x128xf32>
    tpu.vector_store %arg3[%215, %c0_78], %214 {strides = array<i32>} : memref<8x128xf32, #tpu.memory_space<vmem>>, vector<1x128xf32>,
    %c8_i32 = arith.constant 8 : i32
    return
  }
  func.func @transform_0(%arg0: i32, %arg1: memref<64xi32, #tpu.memory_space<smem>>) -> (i32, i32) {
    %c0_i32 = arith.constant 0 : i32
    %c0_i32_0 = arith.constant 0 : i32
    %c0_i32_1 = arith.constant 0 : i32
    return %c0_i32, %c0_i32_0 : i32, i32
  }
  func.func @transform_1(%arg0: i32, %arg1: memref<64xi32, #tpu.memory_space<smem>>) -> (i32, i32) {
    %c0_i32 = arith.constant 0 : i32
    %c0_i32_0 = arith.constant 0 : i32
    return %arg0, %c0_i32 : i32, i32
  }
}

</mosaic_0001>

<bundles_post_ra>
// kernel: tpu_custom_call.1
= control target key start
LH: loop header
LB: loop body
LE: loop exit
PB: predicated region body
PF: predicated region fallthrough
CT: control target
= control target key end

     0   :  { %s656_s9 = smov [#allocation3]   ;;  %s929_s0 = inlined_call_operand.hbm [shape: s32[64], index: 0, kind: input, shape index: {}]   ;;  %s930_s1 = inlined_call_operand.hbm [shape: f32[16,32], index: 1, kind: input, shape index: {}]   ;;  %s931_s2 = inlined_call_operand.hbm [shape: f32[16,128], index: 2, kind: output, shape index: {}]  }
   0x1   :  { %932 = sst [smem:[#allocation11_spill]] %s930_s1 }
   0x2   :  { %8 = dma.hbm_to_smem %s929_s0, 16, %s656_s9, [#allocation2] }
   0x3   :  { %630 = dma.done.wait [#allocation2], 16 }
   0x4   :  { %631 = vsyncadd [#allocation2], 4294967280 }
   0x5   :  { %10 = sfence }
   0x6   :  { %11 = vsyncpa [#allocation5], 0 }
   0x7   :  { %12 = vsyncpa [#allocation6], 0 }
   0x8   :  { %14 = vsyncpa [#allocation6 + $0x1], 0  ;;  %s682_s12 = smov 0   ;;  %s684_s13 = smov 0  }
   0x9   :  { %s686_s14 = smov 0   ;;  %s688_s15 = smov 0  }
   0xa LB: > { %s703_s0 = sadd.s32 4294967295, %s654_s15   ;;  %s487_s16 = sadd.s32 4294967294, %s654_s15   ;;  %s654_s15 = sphi %s688_s15, %s941_s15   ;;  %s650_s14 = sphi %s686_s14, %s940_s14   ;;  %s646_s13 = sphi %s684_s13, %s939_s13   ;;  %s642_s12 = sphi %s682_s12, %s938_s12  }
   0xb   : > { %s707_s17 = sadd.s32 1, %s654_s15   ;;  %s48_s18 = sadd.s32 1, %s650_s14 }
   0xc   : > { %s45_s19 = ssub.s32 %s654_s15, %s707_s17  ;;  %p58_p0 = scmp.ne.s32.totalorder %s650_s14, %s646_s13 }
   0xd   : > { %p46_p1 = scmp.eq.s32.totalorder %s45_s19, 0  ;;  %p59_p2 = scmp.eq.s32.totalorder %s703_s0, 1 }
   0xe   : > { %p64_p3 = scmp.ne.s32.totalorder %s646_s13, %s642_s12  ;;  %p65_p4 = scmp.eq.s32.totalorder %s487_s16, 1 }
   0xf   : > { %s718_s20 = scalar_select %p46_p1, %s650_s14, %s48_s18  }
  0x10   : > { %p720_p5 = por %p59_p2, %p58_p0  ;;  %p724_p6 = por %p65_p4, %p64_p3 }
  0x11   : > { %p488_p7 = scmp.ge.s32.totalorder %s654_s15, 1  ;;  %p72_p8 = scmp.lt.s32.totalorder %s654_s15, 3 }
  0x12   : > { %s934_s22 = scalar_select %p724_p6, 1, 0 }
  0x13   : > { %p512_p9 = scmp.eq.s32.totalorder %s703_s0, 0  ;;  %p731_p10 = pnand %p488_p7, %p72_p8 }
  0x14   : > { %s657_s24 = smov [#allocation4]  }
  0x15   : > { %s84_s25 = sshll.u32 %s657_s24, 4  ;;  %p504_p11 = pneg %p731_p10  ;;  %s85_s25 = int_to_ptr.vmem [resolvable:$true] %s84_s25 }
  0x16   : > { %s573_s26 = scalar_lea.vmem %s85_s25, 256  ;;  %p581_p3 = scmp.lt.s32.totalorder %s85_s25, %s85_s25 }
  0x17   : > { %p505_p12 = pnand %p512_p9, %p504_p11  ;;  %p574_p0 = scmp.ne.s32.totalorder %s85_s25, %s573_s26 }
  0x18   : > { %p582_p4 = scmp.lt.s32.totalorder %s573_s26, %s573_s26 }
  0x19   : > { %p564_p13 = pneg %p505_p12 }
  0x1a   : > { %p583_p6 = por %p582_p4, %p581_p3 }
  0x1b   : > { %p576_p1 = pnand %p574_p0, %p564_p13 }
  0x1d   : > { %p577_p2 = pneg %p576_p1 }
  0x1f   : > { %p584_p7 = pnand %p583_p6, %p577_p2 }
  0x21   : > { %587 = shalt.err (!%p584_p7)
}
  0x22   : > { %s658_s27 = smov 128   ;;  %s659_s28 = smov 8  }
  0x23   : > { %s936_s1 = sld [smem:[#allocation11_spill]] }
  0x25   : > { %100 = sbr.rel (%p731_p10) target bundleno = 229 (0xe5), region = 24 }
  0x29   : > { %507 = dma.hbm_to_vmem [thread:$0]  (!%p505_p12), %s936_s1, 256, %s85_s25, [#allocation5], %s658_s27, %s658_s27, %s659_s28  }
  0x2a   : > { %633 = dma.done.wait (%p512_p9), [#allocation5], 256  }
  0x2b   : > { %635 = vsyncadd (%p512_p9), [#allocation5], 4294967040  ;;  %s749_s3 = sshll.u32 %s703_s0, 5  ;;  %s660_s29 = smov 32   ;;  %vm143_vm0 = vcmask 261120   ;;  %vm145_vm1 = vcmask 523264  }
  0x2c   : > { %s188_s4 = sadd.s32 9, %s749_s3  ;;  %s119_s5 = sadd.s32 1, %s749_s3  ;;  %vm147_vm2 = vcmask 785408  }
  0x2d   : > { %s189_s6 = sld [smem:[#allocation3 + %s188_s4]]  ;;  %s221_s7 = sadd.s32 13, %s749_s3 }
  0x2e   : > { %s120_s8 = sld [smem:[#allocation3 + %s119_s5]]  ;;  %s155_s9 = sadd.s32 5, %s749_s3 }
  0x2f   : > { %s222_s10 = sld [smem:[#allocation3 + %s221_s7]]  ;;  %s287_s11 = sadd.s32 21, %s749_s3 }
  0x30   : > { %s156_s16 = sld [smem:[#allocation3 + %s155_s9]]  ;;  %s254_s18 = sadd.s32 17, %s749_s3 }
  0x31   : > { %s288_s19 = sld [smem:[#allocation3 + %s287_s11]]  ;;  %s353_s23 = sadd.s32 29, %s749_s3 }
  0x32   : > { %s255_s24 = sld [smem:[#allocation3 + %s254_s18]]  ;;  %s320_s25 = sadd.s32 25, %s749_s3 }
  0x33   : > { %s759_s26 = sld [smem:[#allocation3 + %s353_s23]]  ;;  %s190_s27 = scalar_lea.vmem [#allocation4], %s189_s6 }
  0x34   : > { %v191_v0 = vld [vmem:[%s190_s27] sm:$0x1]  ;;  %s761_s28 = sld [smem:[#allocation3 + %s320_s25]]  ;;  %s121_s30 = scalar_lea.vmem [#allocation4], %s120_s8 }
  0x35   : > { %201 = vrot.lane.b32.xlu1 %v191_v0, %s660_s29  ;;  %v122_v1 = vld [vmem:[%s121_s30] sm:$0x1]  ;;  %s223_s4 = scalar_lea.vmem [#allocation4], %s222_s10  ;;  %s159_s5 = sadd.s32 6, %s749_s3 }
  0x36   : > { %132 = vrot.lane.b32.xlu0 %v122_v1, %s660_s29  ;;  %v224_v2 = vld [vmem:[%s223_s4] sm:$0x1]  ;;  %s157_s7 = scalar_lea.vmem [#allocation4], %s156_s16  ;;  %s160_s9 = sld [smem:[#allocation3 + %s159_s5]] }
  0x37   : > { %v158_v3 = vld [vmem:[%s157_s7] sm:$0x1]  ;;  %s123_s6 = sadd.s32 2, %s749_s3  ;;  %s289_s8 = scalar_lea.vmem [#allocation4], %s288_s19 }
  0x38   : > { %s124_s11 = sld [smem:[#allocation3 + %s123_s6]]  ;;  %v290_v4 = vld [vmem:[%s289_s8] sm:$0x1]  ;;  %s225_s10 = sadd.s32 14, %s749_s3 }
  0x39   : > { %234 = vrot.lane.b32.xlu1 %v224_v2, %s660_s29  ;;  %s256_s18 = scalar_lea.vmem [#allocation4], %s255_s24  ;;  %s770_s23 = sld [smem:[#allocation3 + %s225_s10]] }
  0x3a   : > { %168 = vrot.lane.b32.xlu0 %v158_v3, %s660_s29  ;;  %v257_v5 = vld [vmem:[%s256_s18] sm:$0x1]  ;;  %s192_s16 = sadd.s32 10, %s749_s3  ;;  %s291_s27 = sadd.s32 22, %s749_s3 }
  0x3b   : > { %s773_s25 = sld [smem:[#allocation3 + %s192_s16]]  ;;  %s355_s30 = scalar_lea.vmem [#allocation4], %s759_s26 }
  0x3c   : > { %v356_v6 = vld [vmem:[%s355_s30] sm:$0x1]  ;;  %s779_s19 = sld [smem:[#allocation3 + %s291_s27]]  ;;  %s258_s4 = sadd.s32 18, %s749_s3 }
  0x3d   : > { %300 = vrot.lane.b32.xlu1 %v290_v4, %s660_s29  ;;  %s322_s24 = scalar_lea.vmem [#allocation4], %s761_s28  ;;  %s357_s5 = sadd.s32 30, %s749_s3 }
  0x3e   : > { %267 = vrot.lane.b32.xlu0 %v257_v5, %s660_s29  ;;  %v323_v7 = vld [vmem:[%s322_s24] sm:$0x1]  ;;  %s259_s7 = sld [smem:[#allocation3 + %s258_s4]]  ;;  %s324_s6 = sadd.s32 26, %s749_s3 }
  0x3f   : > { %s161_s8 = scalar_lea.vmem [#allocation4], %s160_s9  ;;  %s787_s26 = sld [smem:[#allocation3 + %s357_s5]] }
  0x40   : > { %v162_v8 = vld [vmem:[%s161_s8] sm:$0x1]  ;;  %s125_s10 = scalar_lea.vmem [#allocation4], %s124_s11  ;;  %s789_s18 = sld [smem:[#allocation3 + %s324_s6]] }
  0x41   : > { %366 = vrot.lane.b32.xlu1 %v356_v6, %s660_s29  ;;  %v126_v9 = vld [vmem:[%s125_s10] sm:$0x1]  ;;  %s163_s28 = sadd.s32 7, %s749_s3  ;;  %s127_s16 = sadd.s32 3, %s749_s3 }
  0x42   : > { %333 = vrot.lane.b32.xlu0 %v323_v7, %s660_s29  ;;  %s661_s27 = smov 64   ;;  %s227_s30 = scalar_lea.vmem [#allocation4], %s770_s23 }
  0x43   : > { %v228_v10 = vld [vmem:[%s227_s30] sm:$0x1]  ;;  %s796_s29 = sld [smem:[#allocation3 + %s163_s28]]  ;;  %s194_s9 = scalar_lea.vmem [#allocation4], %s773_s25 }
  0x44   : > { %v195_v11 = vld [vmem:[%s194_s9] sm:$0x1]  ;;  %s128_s11 = sld [smem:[#allocation3 + %s127_s16]]  ;;  %s229_s4 = sadd.s32 15, %s749_s3 }
  0x45   : > { %172 = vrot.lane.b32.xlu1 %v162_v8, %s661_s27  ;;  %s196_s24 = sadd.s32 11, %s749_s3  ;;  %s293_s5 = scalar_lea.vmem [#allocation4], %s779_s19 }
  0x46   : > { %136 = vrot.lane.b32.xlu0 %v126_v9, %s661_s27  ;;  %v294_v12 = vld [vmem:[%s293_s5] sm:$0x1]  ;;  %s260_s23 = scalar_lea.vmem [#allocation4], %s259_s7  ;;  %s230_s6 = sld [smem:[#allocation3 + %s229_s4]] }
  0x47   : > { %v261_v13 = vld [vmem:[%s260_s23] sm:$0x1]  ;;  %s197_s8 = sld [smem:[#allocation3 + %s196_s24]]  ;;  %s295_s25 = sadd.s32 23, %s749_s3 }
  0x48   : > { %s262_s10 = sadd.s32 19, %s749_s3  ;;  %s359_s28 = scalar_lea.vmem [#allocation4], %s787_s26 }
  0x49   : > { %238 = vrot.lane.b32.xlu1 %v228_v10, %s661_s27  ;;  %v360_v14 = vld [vmem:[%s359_s28] sm:$0x1]  ;;  %s326_s16 = scalar_lea.vmem [#allocation4], %s789_s18  ;;  %s296_s30 = sld [smem:[#allocation3 + %s295_s25]] }
  0x4a   : > { %205 = vrot.lane.b32.xlu0 %v195_v11, %s661_s27  ;;  %v327_v15 = vld [vmem:[%s326_s16] sm:$0x1]  ;;  %s263_s19 = sld [smem:[#allocation3 + %s262_s10]]  ;;  %s361_s9 = sadd.s32 31, %s749_s3 }
  0x4b   : > { %s328_s7 = sadd.s32 27, %s749_s3  ;;  %s165_s4 = scalar_lea.vmem [#allocation4], %s796_s29 }
  0x4c   : > { %v166_v16 = vld [vmem:[%s165_s4] sm:$0x1]  ;;  %s129_s24 = scalar_lea.vmem [#allocation4], %s128_s11  ;;  %s362_s5 = sld [smem:[#allocation3 + %s361_s9]] }
  0x4d   : > { %304 = vrot.lane.b32.xlu1 %v294_v12, %s661_s27  ;;  %v130_v17 = vld [vmem:[%s129_s24] sm:$0x1]  ;;  %s329_s23 = sld [smem:[#allocation3 + %s328_s7]]  ;;  %s662_s1 = smov 96  }
  0x4e   : > { %271 = vrot.lane.b32.xlu0 %v261_v13, %s661_s27  ;;  %s231_s26 = scalar_lea.vmem [#allocation4], %s230_s6  ;;  %s198_s18 = scalar_lea.vmem [#allocation4], %s197_s8 }
  0x4f   : > { %v232_v18 = vld [vmem:[%s231_s26] sm:$0x1]  ;;  %s297_s25 = scalar_lea.vmem [#allocation4], %s296_s30  ;;  %s151_s11 = sadd.s32 4, %s749_s3 }
  0x50   : > { %v199_v19 = vld [vmem:[%s198_s18] sm:$0x1]  ;;  %s264_s10 = scalar_lea.vmem [#allocation4], %s263_s19  ;;  %s116_s6 = sld [smem:[#allocation3 + %s749_s3]] }
  0x51   : > { %370 = vrot.lane.b32.xlu1 %v360_v14, %s661_s27  ;;  %v298_v20 = vld [vmem:[%s297_s25] sm:$0x1]  ;;  %s152_s8 = sld [smem:[#allocation3 + %s151_s11]]  ;;  %s217_s28 = sadd.s32 12, %s749_s3 }
  0x52   : > { %337 = vrot.lane.b32.xlu0 %v327_v15, %s661_s27  ;;  %v265_v21 = vld [vmem:[%s264_s10] sm:$0x1]  ;;  %s363_s27 = scalar_lea.vmem [#allocation4], %s362_s5  ;;  %s218_s30 = sld [smem:[#allocation3 + %s217_s28]] }
  0x53   : > { %v364_v22 = vld [vmem:[%s363_s27] sm:$0x1]  ;;  %s330_s29 = scalar_lea.vmem [#allocation4], %s329_s23  ;;  %s283_s19 = sadd.s32 20, %s749_s3 }
  0x54   : > { %v331_v23 = vld [vmem:[%s330_s29] sm:$0x1]  ;;  %s250_s9 = sadd.s32 16, %s749_s3  ;;  %s831_s7 = sld [smem:[#allocation3 + %s283_s19]] }
  0x55   : > { %176 = vrot.lane.b32.xlu1 %v166_v16, %s662_s1  ;;  %s833_s4 = sld [smem:[#allocation3 + %s250_s9]]  ;;  %s349_s24 = sadd.s32 28, %s749_s3 }
  0x56   : > { %140 = vrot.lane.b32.xlu0 %v130_v17, %s662_s1  ;;  %s316_s5 = sadd.s32 24, %s749_s3  ;;  %s112_s23 = sand.u32 1, %s646_s13  }
  0x57   : > { %s153_s26 = scalar_lea.vmem [#allocation4], %s152_s8  ;;  %s117_s18 = scalar_lea.vmem [#allocation4], %s116_s6 }
  0x58   : > { %v154_v38 = vld [vmem:[%s153_s26] sm:$0x1]  ;;  %s838_s25 = sld [smem:[#allocation3 + %s349_s24]]  ;;  %s492_s27 = sshll.u32 %s112_s23, 3 }
  0x59   : > { %242 = vrot.lane.b32.xlu1 %v232_v18, %s662_s1  ;;  %v118_v40 = vld [vmem:[%s117_s18] sm:$0x1]  ;;  %s840_s10 = sld [smem:[#allocation3 + %s316_s5]]  ;;  %s855_s6 = scalar_lea.vmem [#allocation7], %s492_s27 }
  0x5a   : > { %209 = vrot.lane.b32.xlu0 %v199_v19, %s662_s1  ;;  %s285_s11 = scalar_lea.vmem [#allocation4], %s831_s7  ;;  %s663_s24 = smov [#allocation7]  }
  0x5b   : > { %v286_v56 = vld [vmem:[%s285_s11] sm:$0x1]  ;;  %s592_s5 = sshll.u32 %s663_s24, 4  ;;  %s593_s5 = int_to_ptr.vmem [resolvable:$false] %s592_s5 }
  0x5c   : > { %s594_s26 = scalar_lea.vmem %s593_s5, 256 }
  0x5d   : > { %308 = vrot.lane.b32.xlu1 %v298_v20, %s662_s1 }
  0x5e   : > { %275 = vrot.lane.b32.xlu0 %v265_v21, %s662_s1  ;;  %s351_s8 = scalar_lea.vmem [#allocation4], %s838_s25 }
  0x5f   : > { %v352_v4 = vld [vmem:[%s351_s8] sm:$0x1]  ;;  %s318_s28 = scalar_lea.vmem [#allocation4], %s840_s10 }
  0x60   : > { %v319_v7 = vld [vmem:[%s318_s28] sm:$0x1] }
  0x61   : > { %374 = vrot.lane.b32.xlu1 %v364_v22, %s662_s1 }
  0x62   : > { %341 = vrot.lane.b32.xlu0 %v331_v23, %s662_s1  ;;  %s184_s1 = sadd.s32 8, %s749_s3  ;;  %s219_s3 = scalar_lea.vmem [#allocation4], %s218_s30 }
  0x63   : > { %s827_s16 = sld [smem:[#allocation3 + %s184_s1]]  ;;  %v220_v44 = vld [vmem:[%s219_s3] sm:$0x1]  ;;  %s252_s1 = scalar_lea.vmem [#allocation4], %s833_s4 }
  0x64   : > { %v253_v59 = vld [vmem:[%s252_s1] sm:$0x1]  ;;  %s396_s30 = sshll.u32 %s855_s6, 4  ;;  %s397_s30 = int_to_ptr.vmem [resolvable:$true] %s396_s30 }
  0x65   : > { %s588_s4 = scalar_lea.vmem %s397_s30, 128  ;;  %p595_p10 = scmp.lt.s32.totalorder %s397_s30, %s593_s5 }
  0x66   : > { %p589_p6 = scmp.ne.s32.totalorder %s397_s30, %s588_s4  ;;  %p596_p11 = scmp.lt.s32.totalorder %s594_s26, %s588_s4 }
  0x68   : > { %p590_p8 = pnand %p589_p6, %p720_p5  ;;  %p597_p12 = por %p596_p11, %p595_p10 }
  0x69   : > { %s186_s29 = scalar_lea.vmem [#allocation4], %s827_s16  ;;  %s495_s16 = sshll.u32 %s703_s0, 7 }
  0x6a   : > { %v187_v47 = vld [vmem:[%s186_s29] sm:$0x1]  ;;  %s890_s7 = scalar_lea.hbm %s931_s2, %s495_s16  ;;  %s383_s0 = scalar_lea.sflag [#allocation6], %s112_s23 }
  0x6b   : > { %p591_p9 = pneg %p590_p8 }
  0x6d   : > { %p598_p13 = pnand %p597_p12, %p591_p9 }
  0xa7   : > { %v202_v24 = vpop.permute.xlu1 %201 }
  0xa8   : > { %v133_v25 = vpop.permute.xlu0 %132  ;;  %v212_v55 = vsel %vm143_vm0, %v187_v47, %v202_v24 }
  0xa9   : > { %v144_v43 = vsel %vm143_vm0, %v118_v40, %v133_v25 }
  0xab   : > { %v235_v26 = vpop.permute.xlu1 %234 }
  0xac   : > { %v169_v27 = vpop.permute.xlu0 %168  ;;  %v245_v53 = vsel %vm143_vm0, %v220_v44, %v235_v26 }
  0xad   : > { %v179_v42 = vsel %vm143_vm0, %v154_v38, %v169_v27 }
  0xaf   : > { %v815_v28 = vpop.permute.xlu1 %300 }
  0xb0   : > { %v817_v29 = vpop.permute.xlu0 %267  ;;  %v311_v1 = vsel %vm143_vm0, %v286_v56, %v815_v28 }
  0xb1   : > { %v278_v3 = vsel %vm143_vm0, %v253_v59, %v817_v29 }
  0xb3   : > { %v819_v30 = vpop.permute.xlu1 %366 }
  0xb4   : > { %v821_v31 = vpop.permute.xlu0 %333  ;;  %v377_v13 = vsel %vm143_vm0, %v352_v4, %v819_v30 }
  0xb5   : > { %v344_v15 = vsel %vm143_vm0, %v319_v7, %v821_v31 }
  0xb7   : > { %v173_v32 = vpop.permute.xlu1 %172 }
  0xb8   : > { %v137_v33 = vpop.permute.xlu0 %136  ;;  %v180_v45 = vsel %vm145_vm1, %v179_v42, %v173_v32 }
  0xb9   : > { %v146_v48 = vsel %vm145_vm1, %v144_v43, %v137_v33 }
  0xbb   : > { %v239_v34 = vpop.permute.xlu1 %238 }
  0xbc   : > { %v206_v35 = vpop.permute.xlu0 %205  ;;  %v246_v57 = vsel %vm145_vm1, %v245_v53, %v239_v34 }
  0xbd   : > { %v213_v60 = vsel %vm145_vm1, %v212_v55, %v206_v35 }
  0xbf   : > { %v305_v36 = vpop.permute.xlu1 %304 }
  0xc0   : > { %v272_v37 = vpop.permute.xlu0 %271  ;;  %v312_v5 = vsel %vm145_vm1, %v311_v1, %v305_v36 }
  0xc1   : > { %v279_v8 = vsel %vm145_vm1, %v278_v3, %v272_v37 }
  0xc3   : > { %v371_v39 = vpop.permute.xlu1 %370 }
  0xc4   : > { %v338_v41 = vpop.permute.xlu0 %337  ;;  %v378_v16 = vsel %vm145_vm1, %v377_v13, %v371_v39 }
  0xc5   : > { %v345_v18 = vsel %vm145_vm1, %v344_v15, %v338_v41 }
  0xc7   : > { %v177_v46 = vpop.permute.xlu1 %176 }
  0xc8   : > { %v181_v49 = vsel %vm147_vm2, %v180_v45, %v177_v46  ;;  %v141_v50 = vpop.permute.xlu0 %140 }
  0xc9   : > { %v182_v51 = vmul.f32 5.656854, %v181_v49  ;;  %v148_v52 = vsel %vm147_vm2, %v146_v48, %v141_v50 }
  0xca   : > { %v149_v54 = vmul.f32 5.656854, %v148_v52 }
  0xcb   : > { %183 = vst [vmem:[%s855_s6 + $0x1] sm:$0x1] %v182_v51  ;;  %v243_v58 = vpop.permute.xlu1 %242 }
  0xcc   : > { %150 = vst [vmem:[%s855_s6] sm:$0x1] %v149_v54  ;;  %v247_v61 = vsel %vm147_vm2, %v246_v57, %v243_v58  ;;  %v210_v62 = vpop.permute.xlu0 %209 }
  0xcd   : > { %v248_v63 = vmul.f32 5.656854, %v247_v61  ;;  %v214_v0 = vsel %vm147_vm2, %v213_v60, %v210_v62 }
  0xce   : > { %v215_v2 = vmul.f32 5.656854, %v214_v0 }
  0xcf   : > { %249 = vst [vmem:[%s855_s6 + $0x3] sm:$0x1] %v248_v63  ;;  %v309_v6 = vpop.permute.xlu1 %308 }
  0xd0   : > { %216 = vst [vmem:[%s855_s6 + $0x2] sm:$0x1] %v215_v2  ;;  %v313_v9 = vsel %vm147_vm2, %v312_v5, %v309_v6  ;;  %v276_v10 = vpop.permute.xlu0 %275 }
  0xd1   : > { %v314_v11 = vmul.f32 5.656854, %v313_v9  ;;  %v280_v12 = vsel %vm147_vm2, %v279_v8, %v276_v10 }
  0xd2   : > { %v281_v14 = vmul.f32 5.656854, %v280_v12 }
  0xd3   : > { %315 = vst [vmem:[%s855_s6 + $0x5] sm:$0x1] %v314_v11  ;;  %v375_v17 = vpop.permute.xlu1 %374 }
  0xd4   : > { %282 = vst [vmem:[%s855_s6 + $0x4] sm:$0x1] %v281_v14  ;;  %v379_v19 = vsel %vm147_vm2, %v378_v16, %v375_v17  ;;  %v342_v20 = vpop.permute.xlu0 %341 }
  0xd5   : > { %v380_v21 = vmul.f32 5.656854, %v379_v19  ;;  %v346_v22 = vsel %vm147_vm2, %v345_v18, %v342_v20 }
  0xd6   : > { %v347_v23 = vmul.f32 5.656854, %v346_v22 }
  0xd7   : > { %381 = vst [vmem:[%s855_s6 + $0x7] sm:$0x1] %v380_v21 }
  0xd8   : > { %348 = vst [vmem:[%s855_s6 + $0x6] sm:$0x1] %v347_v23 }
  0xd9   : > { %601 = shalt.err (!%p598_p13)
}
  0xda   : > { %s602_s18 = scalar_lea.hbm %s890_s7, 128  ;;  %s606_s10 = scalar_lea.hbm %s931_s2, 256 }
  0xdb   : > { %p603_p0 = scmp.ne.s32.totalorder %s890_s7, %s602_s18  ;;  %p607_p3 = scmp.lt.s32.totalorder %s890_s7, %s931_s2 }
  0xdc   : > { %p608_p4 = scmp.lt.s32.totalorder %s606_s10, %s602_s18 }
  0xdd   : > { %p604_p1 = pnand %p603_p0, %p720_p5 }
  0xde   : > { %p609_p7 = por %p608_p4, %p607_p3 }
  0xdf   : > { %p605_p2 = pneg %p604_p1 }
  0xe1   : > { %p610_p6 = pnand %p609_p7, %p605_p2 }
  0xe3   : > { %613 = shalt.err (!%p610_p6)
}
  0xe4   : > { %502 = dma.vmem_to_hbm [thread:$0]  (%p720_p5), %s397_s30, 128, %s890_s7, %s383_s0  }
  0xe5 PF: > { %p514_p8 = scmp.ge.s32.totalorder %s654_s15, 2  ;;  %s408_s29 = sand.u32 1, %s642_s12  }
  0xe6   : > { %p937_p9 = scmp.ne.s32.totalorder %s934_s22, 0  ;;  %s409_s11 = scalar_lea.sflag [#allocation6], %s408_s29 }
  0xe8   : > { %p509_p10 = pnand %p514_p8, %p937_p9 }
  0xea   : > { %p510_p11 = pneg %p509_p10 }
  0xec   : > { %637 = dma.done.wait (%p510_p11), %s409_s11, 128  }
  0xed   : > { %639 = vsyncadd (%p510_p11), %s409_s11, 4294967168  ;;  %p17_p12 = scmp.ge.s32.totalorder %s707_s17, 4   ;;  %s938_s12 = smov %s646_s13 }
  0xee   : > { %s939_s13 = smov %s650_s14  ;;  %s940_s14 = smov %s718_s20 }
  0xef   : > { %s941_s15 = smov %s707_s17  ;;  %19 = sbr.rel (!%p17_p12) target bundleno = 10 (0xa), region = 93 }
  0xf4   :  { %414 = vsyncpa [#allocation5], 1 }
  0xf5   :  { %416 = vsyncpa [#allocation5 + $0x1], 1 }
  0xf6   :  { %417 = vsyncpa [#allocation6], 1 }
  0xf7   :  { %419 = vsyncpa [#allocation6 + $0x1], 1 }

</bundles_post_ra>
